<compile_context>
chip_gen: v7x
topology: tpu7x:2x2x1
jax: 0.10.0
libtpu: 0.0.40
codegen_flags: <defaults>
</compile_context>

<pallas_src>
import functools

import jax
import jax.numpy as jnp
from jax.experimental import pallas as pl
from jax.experimental.pallas import tpu as pltpu


def _head_mlp_kernel(feat_ref, past_ref, intent_ref,
                     w1f_ref, w1p_ref, w1i_ref, b1_ref,
                     w2_ref, b2_ref, o_ref):
    # Fused concat + Linear -> ReLU -> Linear. Inputs arrive f32, are cast to
    # bf16 in-vreg; all matmuls accumulate in f32 on the MXU.
    feat = feat_ref[...].astype(jnp.bfloat16)
    past = past_ref[...].astype(jnp.bfloat16)
    intent = intent_ref[...].astype(jnp.bfloat16)

    # x @ W1 as three partial matmuls over the concat segments (fused concat).
    h = jnp.dot(feat, w1f_ref[...], preferred_element_type=jnp.float32)
    h = h + jnp.dot(past, w1p_ref[...], preferred_element_type=jnp.float32)
    h = h + jnp.dot(intent, w1i_ref[...], preferred_element_type=jnp.float32)
    h = jnp.maximum(h + b1_ref[...], 0.0)          # bias + ReLU
    # TODO(synk): Dropout(0.2) omitted — identity at eval time (no train RNG).

    y = jnp.dot(h.astype(jnp.bfloat16), w2_ref[...],
                preferred_element_type=jnp.float32)
    o_ref[...] = (y + b2_ref[...]).astype(o_ref.dtype)


def prepare_kernel_params(raw, feature_dim, past_dim=32, intent_dim=16):
    """Split W1 by concat segment, cast weights to bf16, lane-pad W2/b2 to 128."""
    w1, b1, w2, b2 = raw["w1"], raw["b1"], raw["w2"], raw["b2"]
    out_dim = w2.shape[1]
    out_pad = max(128, ((out_dim + 127) // 128) * 128)
    pad_n = out_pad - out_dim
    return {
        "w1_feat": w1[:feature_dim].astype(jnp.bfloat16),
        "w1_past": w1[feature_dim:feature_dim + past_dim].astype(jnp.bfloat16),
        "w1_intent": w1[feature_dim + past_dim:
                        feature_dim + past_dim + intent_dim].astype(jnp.bfloat16),
        "b1": b1.astype(jnp.float32),
        "w2": jnp.pad(w2, ((0, 0), (0, pad_n))).astype(jnp.bfloat16),
        "b2": jnp.pad(b2, ((0, 0), (0, pad_n))).astype(jnp.float32),
        "out_dim": out_dim,
    }


@functools.partial(jax.jit, static_argnames=("future_len", "block_b"))
def head_model_forward(feat, past, intent_emb, kparams, future_len=20,
                       block_b=512):
    """feat: (B, feature_dim), past: (B, 16, 2), intent_emb: (B, intent_dim)."""
    B = feat.shape[0]
    past_flat = past.reshape(B, -1)

    fd = feat.shape[1]
    pd = past_flat.shape[1]
    idim = intent_emb.shape[1]
    hidden = kparams["b1"].shape[1]
    out_pad = kparams["w2"].shape[1]
    out_dim = future_len * 2

    # --- batch tiling (weights stay resident across batch blocks) ---
    if B <= block_b:
        tb, Bp = B, B
    else:
        tb = block_b
        Bp = ((B + tb - 1) // tb) * tb
    if Bp != B:
        pad = Bp - B
        feat = jnp.pad(feat, ((0, pad), (0, 0)))
        past_flat = jnp.pad(past_flat, ((0, pad), (0, 0)))
        intent_emb = jnp.pad(intent_emb, ((0, pad), (0, 0)))

    out_padded = pl.pallas_call(
        _head_mlp_kernel,
        out_shape=jax.ShapeDtypeStruct((Bp, out_pad), jnp.float32),
        grid_spec=pl.GridSpec(
            grid=(Bp // tb,),
            in_specs=[
                pl.BlockSpec((tb, fd), lambda i: (i, 0)),
                pl.BlockSpec((tb, pd), lambda i: (i, 0)),
                pl.BlockSpec((tb, idim), lambda i: (i, 0)),
                # weights / biases: constant block index -> stay pinned in VMEM
                pl.BlockSpec((fd, hidden), lambda i: (0, 0)),
                pl.BlockSpec((pd, hidden), lambda i: (0, 0)),
                pl.BlockSpec((idim, hidden), lambda i: (0, 0)),
                pl.BlockSpec((1, hidden), lambda i: (0, 0)),
                pl.BlockSpec((hidden, out_pad), lambda i: (0, 0)),
                pl.BlockSpec((1, out_pad), lambda i: (0, 0)),
            ],
            out_specs=pl.BlockSpec((tb, out_pad), lambda i: (i, 0)),
        ),
        compiler_params=pltpu.CompilerParams(
            dimension_semantics=("parallel",),
        ),
    )(feat, past_flat, intent_emb,
      kparams["w1_feat"], kparams["w1_past"], kparams["w1_intent"],
      kparams["b1"], kparams["w2"], kparams["b2"])

    return out_padded[:B, :out_dim].reshape(B, future_len, 2)


def init_params(key, feature_dim, intent_dim=16, future_len=20):
    """Deterministic synthetic f32 params (PyTorch nn.Linear scale), x@W layout."""
    total = feature_dim + 16 * 2 + intent_dim
    hidden = 1024
    out_dim = future_len * 2
    k1, k2, k3, k4 = jax.random.split(key, 4)
    lim1 = 1.0 / jnp.sqrt(total)
    lim2 = 1.0 / jnp.sqrt(hidden)
    return {
        "w1": jax.random.uniform(k1, (total, hidden), jnp.float32, -lim1, lim1),
        "b1": jax.random.uniform(k2, (1, hidden), jnp.float32, -lim1, lim1),
        "w2": jax.random.uniform(k3, (hidden, out_dim), jnp.float32, -lim2, lim2),
        "b2": jax.random.uniform(k4, (1, out_dim), jnp.float32, -lim2, lim2),
    }


if __name__ == "__main__":
    B = 2
    feature_dim = 64      # stands in for ckpt['feature_dim']
    intent_dim = 16
    future_len = 20
    out_dim = future_len * 2

    key = jax.random.PRNGKey(0)
    kp, kf, kpast, kint = jax.random.split(key, 4)

    raw = init_params(kp, feature_dim, intent_dim, future_len)
    kparams = prepare_kernel_params(raw, feature_dim, past_dim=32,
                                    intent_dim=intent_dim)

    feat = jax.random.normal(kf, (B, feature_dim), jnp.float32)
    past = jax.random.normal(kpast, (B, 16, 2), jnp.float32)
    # intent embedding lookup (Embedding(4, 16)) done as glue:
    intent_table = jax.random.normal(kint, (4, intent_dim), jnp.float32)
    intent_ids = jnp.array([1, 3], dtype=jnp.int32)
    intent = intent_table[intent_ids]

    out = head_model_forward(feat, past, intent, kparams, future_len=future_len)
    out = jax.block_until_ready(out)
    assert out.shape == (B, future_len, 2)

    # --- reference 1: bf16-matched math (tight tolerance) ---
    x = jnp.concatenate([feat, past.reshape(B, -1), intent], axis=1)
    w1_bf = jnp.concatenate(
        [kparams["w1_feat"], kparams["w1_past"], kparams["w1_intent"]], axis=0)
    h_ref = jnp.maximum(
        jnp.dot(x.astype(jnp.bfloat16), w1_bf,
                preferred_element_type=jnp.float32) + kparams["b1"], 0.0)
    y_ref = jnp.dot(h_ref.astype(jnp.bfloat16), kparams["w2"],
                    preferred_element_type=jnp.float32) + kparams["b2"]
    ref_bf = y_ref[:, :out_dim].reshape(B, future_len, 2)
    assert jnp.allclose(out, ref_bf, atol=2e-3, rtol=2e-3)

    # --- reference 2: full f32 PyTorch-equivalent math (loose tolerance) ---
    ref_f32 = (jnp.maximum(x @ raw["w1"] + raw["b1"], 0.0) @ raw["w2"]
               + raw["b2"]).reshape(B, future_len, 2)
    assert jnp.allclose(out, ref_f32, atol=5e-2, rtol=5e-2)

    print("KERNEL_OK")
</pallas_src>

<mosaic_0001>
module attributes {stable_mosaic.version = 11 : i64} {
  func.func @_head_mlp_kernel(%arg0: i32, %arg1: memref<2x64xf32, #tpu.memory_space<vmem>>, %arg2: memref<2x32xf32, #tpu.memory_space<vmem>>, %arg3: memref<2x16xf32, #tpu.memory_space<vmem>>, %arg4: memref<64x1024xbf16, #tpu.memory_space<vmem>>, %arg5: memref<32x1024xbf16, #tpu.memory_space<vmem>>, %arg6: memref<16x1024xbf16, #tpu.memory_space<vmem>>, %arg7: memref<1x1024xf32, #tpu.memory_space<vmem>>, %arg8: memref<1024x128xbf16, #tpu.memory_space<vmem>>, %arg9: memref<1x128xf32, #tpu.memory_space<vmem>>, %arg10: memref<2x128xf32, #tpu.memory_space<vmem>>) attributes {dimension_semantics = [#tpu.dimension_semantics<parallel>], iteration_bounds = array<i64: 1>, scalar_prefetch = 0 : i64, scratch_operands = 0 : i64, tpu.core_type = #tpu.core_type<tc>, window_params = [{transform_indices = @transform_0, window_bounds = array<i64: 2, 64>}, {transform_indices = @transform_1, window_bounds = array<i64: 2, 32>}, {transform_indices = @transform_2, window_bounds = array<i64: 2, 16>}, {pipeline_mode = #tpu.pipeline_mode<synchronous>, transform_indices = @transform_3, window_bounds = array<i64: 64, 1024>}, {pipeline_mode = #tpu.pipeline_mode<synchronous>, transform_indices = @transform_4, window_bounds = array<i64: 32, 1024>}, {pipeline_mode = #tpu.pipeline_mode<synchronous>, transform_indices = @transform_5, window_bounds = array<i64: 16, 1024>}, {pipeline_mode = #tpu.pipeline_mode<synchronous>, transform_indices = @transform_6, window_bounds = array<i64: 1, 1024>}, {pipeline_mode = #tpu.pipeline_mode<synchronous>, transform_indices = @transform_7, window_bounds = array<i64: 1024, 128>}, {pipeline_mode = #tpu.pipeline_mode<synchronous>, transform_indices = @transform_8, window_bounds = array<i64: 1, 128>}, {transform_indices = @transform_9, window_bounds = array<i64: 2, 128>}]} {
    %c0 = arith.constant 0 : index
    %c0_0 = arith.constant 0 : index
    %0 = vector.load %arg1[%c0, %c0_0] : memref<2x64xf32, #tpu.memory_space<vmem>>, vector<2x64xf32>
    %1 = arith.truncf %0 : vector<2x64xf32> to vector<2x64xbf16>
    %c0_1 = arith.constant 0 : index
    %c0_2 = arith.constant 0 : index
    %2 = vector.load %arg2[%c0_1, %c0_2] : memref<2x32xf32, #tpu.memory_space<vmem>>, vector<2x32xf32>
    %3 = arith.truncf %2 : vector<2x32xf32> to vector<2x32xbf16>
    %c0_3 = arith.constant 0 : index
    %c0_4 = arith.constant 0 : index
    %4 = vector.load %arg3[%c0_3, %c0_4] : memref<2x16xf32, #tpu.memory_space<vmem>>, vector<2x16xf32>
    %5 = arith.truncf %4 : vector<2x16xf32> to vector<2x16xbf16>
    %c0_5 = arith.constant 0 : index
    %c0_6 = arith.constant 0 : index
    %6 = vector.load %arg4[%c0_5, %c0_6] : memref<64x1024xbf16, #tpu.memory_space<vmem>>, vector<64x1024xbf16>
    %cst = arith.constant dense<0.000000e+00> : vector<2x1024xf32>
    %7 = tpu.matmul %1, %6, %cst {dimension_numbers = #tpu.dot_dimension_numbers<[1], [0], [0], [1], [0, 0, 1, 1], [], []>} : vector<2x64xbf16>, vector<64x1024xbf16>, vector<2x1024xf32> -> vector<2x1024xf32>
    %c0_7 = arith.constant 0 : index
    %c0_8 = arith.constant 0 : index
    %8 = vector.load %arg5[%c0_7, %c0_8] : memref<32x1024xbf16, #tpu.memory_space<vmem>>, vector<32x1024xbf16>
    %cst_9 = arith.constant dense<0.000000e+00> : vector<2x1024xf32>
    %9 = tpu.matmul %3, %8, %cst_9 {dimension_numbers = #tpu.dot_dimension_numbers<[1], [0], [0], [1], [0, 0, 1, 1], [], []>} : vector<2x32xbf16>, vector<32x1024xbf16>, vector<2x1024xf32> -> vector<2x1024xf32>
    %10 = arith.addf %7, %9 : vector<2x1024xf32>
    %c0_10 = arith.constant 0 : index
    %c0_11 = arith.constant 0 : index
    %11 = vector.load %arg6[%c0_10, %c0_11] : memref<16x1024xbf16, #tpu.memory_space<vmem>>, vector<16x1024xbf16>
    %cst_12 = arith.constant dense<0.000000e+00> : vector<2x1024xf32>
    %12 = tpu.matmul %5, %11, %cst_12 {dimension_numbers = #tpu.dot_dimension_numbers<[1], [0], [0], [1], [0, 0, 1, 1], [], []>} : vector<2x16xbf16>, vector<16x1024xbf16>, vector<2x1024xf32> -> vector<2x1024xf32>
    %13 = arith.addf %10, %12 : vector<2x1024xf32>
    %c0_13 = arith.constant 0 : index
    %c0_14 = arith.constant 0 : index
    %14 = vector.load %arg7[%c0_13, %c0_14] : memref<1x1024xf32, #tpu.memory_space<vmem>>, vector<1x1024xf32>
    %15 = vector.broadcast %14 : vector<1x1024xf32> to vector<2x1024xf32>
    %16 = arith.addf %13, %15 : vector<2x1024xf32>
    %cst_15 = arith.constant 0.000000e+00 : f32
    %17 = vector.broadcast %cst_15 : f32 to vector<2x1024xf32>
    %18 = arith.maximumf %16, %17 : vector<2x1024xf32>
    %19 = arith.truncf %18 : vector<2x1024xf32> to vector<2x1024xbf16>
    %c0_16 = arith.constant 0 : index
    %c0_17 = arith.constant 0 : index
    %20 = vector.load %arg8[%c0_16, %c0_17] : memref<1024x128xbf16, #tpu.memory_space<vmem>>, vector<1024x128xbf16>
    %cst_18 = arith.constant dense<0.000000e+00> : vector<2x128xf32>
    %21 = tpu.matmul %19, %20, %cst_18 {dimension_numbers = #tpu.dot_dimension_numbers<[1], [0], [0], [1], [0, 0, 1, 1], [], []>} : vector<2x1024xbf16>, vector<1024x128xbf16>, vector<2x128xf32> -> vector<2x128xf32>
    %c0_19 = arith.constant 0 : index
    %c0_20 = arith.constant 0 : index
    %22 = vector.load %arg9[%c0_19, %c0_20] : memref<1x128xf32, #tpu.memory_space<vmem>>, vector<1x128xf32>
    %23 = vector.broadcast %22 : vector<1x128xf32> to vector<2x128xf32>
    %24 = arith.addf %21, %23 : vector<2x128xf32>
    %c0_21 = arith.constant 0 : index
    %c0_22 = arith.constant 0 : index
    %25 = vector.load %arg10[%c0_21, %c0_22] : memref<2x128xf32, #tpu.memory_space<vmem>>, vector<2x128xf32>
    tpu.vector_store %arg10[%c0_21, %c0_22], %24 {strides = array<i32>} : memref<2x128xf32, #tpu.memory_space<vmem>>, vector<2x128xf32>,
    return
  }
  func.func @transform_0(%arg0: i32) -> (i32, i32) {
    %c0_i32 = arith.constant 0 : i32
    %c0_i32_0 = arith.constant 0 : i32
    return %arg0, %c0_i32 : i32, i32
  }
  func.func @transform_1(%arg0: i32) -> (i32, i32) {
    %c0_i32 = arith.constant 0 : i32
    %c0_i32_0 = arith.constant 0 : i32
    return %arg0, %c0_i32 : i32, i32
  }
  func.func @transform_2(%arg0: i32) -> (i32, i32) {
    %c0_i32 = arith.constant 0 : i32
    %c0_i32_0 = arith.constant 0 : i32
    return %arg0, %c0_i32 : i32, i32
  }
  func.func @transform_3(%arg0: i32) -> (i32, i32) {
    %c0_i32 = arith.constant 0 : i32
    %c0_i32_0 = arith.constant 0 : i32
    %c0_i32_1 = arith.constant 0 : i32
    return %c0_i32, %c0_i32_0 : i32, i32
  }
  func.func @transform_4(%arg0: i32) -> (i32, i32) {
    %c0_i32 = arith.constant 0 : i32
    %c0_i32_0 = arith.constant 0 : i32
    %c0_i32_1 = arith.constant 0 : i32
    return %c0_i32, %c0_i32_0 : i32, i32
  }
  func.func @transform_5(%arg0: i32) -> (i32, i32) {
    %c0_i32 = arith.constant 0 : i32
    %c0_i32_0 = arith.constant 0 : i32
    %c0_i32_1 = arith.constant 0 : i32
    return %c0_i32, %c0_i32_0 : i32, i32
  }
  func.func @transform_6(%arg0: i32) -> (i32, i32) {
    %c0_i32 = arith.constant 0 : i32
    %c0_i32_0 = arith.constant 0 : i32
    %c0_i32_1 = arith.constant 0 : i32
    return %c0_i32, %c0_i32_0 : i32, i32
  }
  func.func @transform_7(%arg0: i32) -> (i32, i32) {
    %c0_i32 = arith.constant 0 : i32
    %c0_i32_0 = arith.constant 0 : i32
    %c0_i32_1 = arith.constant 0 : i32
    return %c0_i32, %c0_i32_0 : i32, i32
  }
  func.func @transform_8(%arg0: i32) -> (i32, i32) {
    %c0_i32 = arith.constant 0 : i32
    %c0_i32_0 = arith.constant 0 : i32
    %c0_i32_1 = arith.constant 0 : i32
    return %c0_i32, %c0_i32_0 : i32, i32
  }
  func.func @transform_9(%arg0: i32) -> (i32, i32) {
    %c0_i32 = arith.constant 0 : i32
    %c0_i32_0 = arith.constant 0 : i32
    return %arg0, %c0_i32 : i32, i32
  }
}

</mosaic_0001>

<bundles_post_ra>
// kernel: head_model_forward.1
= control target key start
LH: loop header
LB: loop body
LE: loop exit
PB: predicated region body
PF: predicated region fallthrough
CT: control target
= control target key end

     0   :  { %14 = vsyncpa [#allocation3], 0  ;;  %s2242_s0 = inlined_call_operand.vmem [shape: f32[2,64], index: 0, kind: input, shape index: {}]   ;;  %s2243_s1 = inlined_call_operand.vmem [shape: f32[2,32], index: 1, kind: input, shape index: {}]   ;;  %s2244_s2 = inlined_call_operand.vmem [shape: f32[2,16], index: 2, kind: input, shape index: {}]   ;;  %s2245_s3 = inlined_call_operand.hbm [shape: bf16[64,1024], index: 3, kind: input, shape index: {}]   ;;  %s2246_s4 = inlined_call_operand.hbm [shape: bf16[32,1024], index: 4, kind: input, shape index: {}]   ;;  %s2247_s5 = inlined_call_operand.vmem [shape: bf16[16,1024], index: 5, kind: input, shape index: {}]   ;;  %s2248_s6 = inlined_call_operand.vmem [shape: f32[1,1024], index: 6, kind: input, shape index: {}]   ;;  %s2249_s7 = inlined_call_operand.hbm [shape: bf16[1024,128], index: 7, kind: input, shape index: {}]   ;;  %s2250_s8 = inlined_call_operand.vmem [shape: f32[1,128], index: 8, kind: input, shape index: {}]   ;;  %s2251_s9 = inlined_call_operand.vmem [shape: f32[2,128], index: 9, kind: output, shape index: {}]  }
   0x1   :  { %15 = vsyncpa [#allocation5], 0  ;;  %s2043_s30 = smov [#allocation4]   ;;  %s2044_s11 = smov [#allocation2]  }
   0x2   :  { %s39_s10 = sshll.u32 %s2043_s30, 4  ;;  %s27_s12 = sshll.u32 %s2044_s11, 4  ;;  %s40_s10 = int_to_ptr.vmem [resolvable:$true] %s39_s10  ;;  %s2101_s12 = int_to_ptr.vmem [resolvable:$true] %s27_s12 }
   0x3   :  { %s1973_s15 = scalar_lea.hbm %s2246_s4, 2048 }
   0x4   :  { %p1974_p0 = scmp.ne.s32.totalorder %s2246_s4, %s1973_s15  ;;  %p1977_p1 = scmp.lt.u32.totalorder %s1973_s15, %s2246_s4 }
   0x6   :  { %p1979_p2 = pnand %p1977_p1, %p1974_p0 }
   0x8   :  { %1982 = shalt.err (!%p1979_p2)
}
   0x9   :  { %s1983_s20 = scalar_lea.vmem %s40_s10, 2048  ;;  %p1988_p4 = scmp.lt.s32.totalorder %s40_s10, %s40_s10 }
   0xa   :  { %p1984_p3 = scmp.ne.s32.totalorder %s40_s10, %s1983_s20  ;;  %p1989_p5 = scmp.lt.s32.totalorder %s1983_s20, %s1983_s20 }
   0xc   :  { %p1990_p6 = por %p1989_p5, %p1988_p4 }
   0xe   :  { %p1991_p7 = pnand %p1990_p6, %p1984_p3 }
  0x10   :  { %1994 = shalt.err (!%p1991_p7)
}
  0x11   :  { %s2045_s21 = smov 512   ;;  %s2046_s22 = smov 32  }
  0x12   :  { %45 = dma.hbm_to_vmem [thread:$0]  %s2246_s4, 2048, %s40_s10, [#allocation5], %s2045_s21, %s2045_s21, %s2046_s22  }
  0x13   :  { %s1995_s27 = scalar_lea.hbm %s2245_s3, 4096 }
  0x14   :  { %p1996_p8 = scmp.ne.s32.totalorder %s2245_s3, %s1995_s27  ;;  %p1999_p9 = scmp.lt.u32.totalorder %s1995_s27, %s2245_s3 }
  0x16   :  { %p2001_p10 = pnand %p1999_p9, %p1996_p8 }
  0x18   :  { %2004 = shalt.err (!%p2001_p10)
}
  0x19   :  { %s2005_s13 = scalar_lea.vmem %s2101_s12, 4096  ;;  %p2010_p12 = scmp.lt.s32.totalorder %s2101_s12, %s2101_s12 }
  0x1a   :  { %p2006_p11 = scmp.ne.s32.totalorder %s2101_s12, %s2005_s13  ;;  %p2011_p13 = scmp.lt.s32.totalorder %s2005_s13, %s2005_s13 }
  0x1c   :  { %p2012_p0 = por %p2011_p13, %p2010_p12 }
  0x1e   :  { %p2013_p1 = pnand %p2012_p0, %p2006_p11 }
  0x20   :  { %2016 = shalt.err (!%p2013_p1)
}
  0x21   :  { %33 = dma.hbm_to_vmem [thread:$0]  %s2245_s3, 4096, %s2101_s12, [#allocation3], %s2045_s21, %s2045_s21, %s2046_s22  }
  0x22   :  { %s2047_s14 = smov [#allocation6]   ;;  %s2017_s18 = scalar_lea.hbm %s2249_s7, 8192 }
  0x23   :  { %s55_s15 = sshll.u32 %s2047_s14, 4  ;;  %p2018_p2 = scmp.ne.s32.totalorder %s2249_s7, %s2017_s18  ;;  %s56_s15 = int_to_ptr.vmem [resolvable:$true] %s55_s15 }
  0x24   :  { %p2021_p3 = scmp.lt.u32.totalorder %s2017_s18, %s2249_s7 }
  0x26   :  { %p2023_p4 = pnand %p2021_p3, %p2018_p2 }
  0x28   :  { %2026 = shalt.err (!%p2023_p4)
}
  0x29   :  { %s2027_s25 = scalar_lea.vmem %s56_s15, 8192  ;;  %p2032_p6 = scmp.lt.s32.totalorder %s56_s15, %s56_s15 }
  0x2a   :  { %p2028_p5 = scmp.ne.s32.totalorder %s56_s15, %s2027_s25  ;;  %p2033_p7 = scmp.lt.s32.totalorder %s2027_s25, %s2027_s25 }
  0x2c   :  { %p2034_p8 = por %p2033_p7, %p2032_p6 }
  0x2e   :  { %p2035_p9 = pnand %p2034_p8, %p2028_p5 }
  0x30   :  { %2038 = shalt.err (!%p2035_p9)
}
  0x31   :  { %s2048_s3 = smov 64   ;;  %s2049_s12 = smov 4  }
  0x32   :  { %61 = dma.hbm_to_vmem [thread:$0]  %s2249_s7, 8192, %s56_s15, [#allocation5], %s2048_s3, %s2048_s3, %s2049_s12  }
  0x33   :  { %2039 = dma.done.wait [#allocation3], 4096  }
  0x34   :  { %2040 = vsyncadd [#allocation3], 4294963200 }
  0x35   :  { %2041 = dma.done.wait [#allocation5], 10240  }
  0x36   :  { %2042 = vsyncadd [#allocation5], 4294957056  ;;  %v2050_v0 = vmov 0   ;;  %v112_v1 = vld [vmem:[#allocation4] sm:$0xff]  ;;  %v113_v3 = vld [vmem:[#allocation4 + $0x8] sm:$0xff]  ;;  %vm208_vm0 = vcmask 261120  }
  0x37   :  { %244 = vmatprep.mubr.bf16.mxu0 %v2050_v0  ;;  %285 = vmatprep.mubr.bf16.mxu1 %v2050_v0  ;;  %v116_v2 = vld [vmem:[#allocation4 + $0x20] sm:$0xff]  ;;  %v117_v5 = vld [vmem:[#allocation4 + $0x28] sm:$0xff]  ;;  %v114_v15 = vld [vmem:[#allocation4 + $0x10] sm:$0xff]  ;;  %vm536_vm1 = vcmask 523264   ;;  %vm752_vm2 = vcmask 130048  }
  0x38   :  { %v1681_v4 = vcombine.high %v112_v1, %v116_v2  ;;  %v1680_v6 = vcombine.low %v112_v1, %v116_v2  ;;  %v120_v7 = vld [vmem:[#allocation4 + $0x40] sm:$0xff]  ;;  %v1683_v9 = vcombine.high %v113_v3, %v117_v5  ;;  %v1682_v10 = vcombine.low %v113_v3, %v117_v5  ;;  %v121_v12 = vld [vmem:[#allocation4 + $0x48] sm:$0xff]  ;;  %v118_v16 = vld [vmem:[#allocation4 + $0x30] sm:$0xff] }
  0x39   :  { %v124_v8 = vld [vmem:[#allocation4 + $0x60] sm:$0xff]  ;;  %v125_v13 = vld [vmem:[#allocation4 + $0x68] sm:$0xff]  ;;  %v115_v17 = vld [vmem:[#allocation4 + $0x18] sm:$0xff]  ;;  %v1685_v22 = vcombine.high %v114_v15, %v118_v16  ;;  %v1684_v29 = vcombine.low %v114_v15, %v118_v16 }
  0x3a   :  { %v1689_v11 = vcombine.high %v120_v7, %v124_v8  ;;  %212 = vmatprep.subr.bf16.mxu0 %v1681_v4  ;;  %v1691_v14 = vcombine.high %v121_v12, %v125_v13  ;;  %253 = vmatprep.subr.bf16.mxu1 %v1683_v9  ;;  %v1688_v18 = vcombine.low %v120_v7, %v124_v8  ;;  %v76_v19 = vld [vmem:[%s2243_s1] sm:$0x3]  ;;  %v119_v20 = vld [vmem:[#allocation4 + $0x38] sm:$0xff]  ;;  %v122_v24 = vld [vmem:[#allocation4 + $0x50] sm:$0xff] }
  0x3b   :  { %213 = vmatpush1.bf16.msra.mxu0 %v1680_v6  ;;  %254 = vmatpush1.bf16.msra.mxu1 %v1682_v10  ;;  %v1690_v21 = vcombine.low %v121_v12, %v125_v13  ;;  %v1687_v23 = vcombine.high %v115_v17, %v119_v20  ;;  %v126_v25 = vld [vmem:[#allocation4 + $0x70] sm:$0xff]  ;;  %v77_v26 = vpack.c.bf16 %v76_v19, %v76_v19  ;;  %v123_v27 = vld [vmem:[#allocation4 + $0x58] sm:$0xff]  ;;  %v80_v33 = vld [vmem:[#allocation2] sm:$0xff] }
  0x3c   :  { %214 = vmatprep.subr.bf16.mxu0 %v1689_v11  ;;  %255 = vmatprep.subr.bf16.mxu1 %v1691_v14  ;;  %v127_v28 = vld [vmem:[#allocation4 + $0x78] sm:$0xff]  ;;  %v1686_v30 = vcombine.low %v115_v17, %v119_v20  ;;  %v1693_v31 = vcombine.high %v122_v24, %v126_v25  ;;  %v84_v34 = vld [vmem:[#allocation2 + $0x20] sm:$0xff]  ;;  %v81_v35 = vld [vmem:[#allocation2 + $0x8] sm:$0xff]  ;;  %v1692_v37 = vcombine.low %v122_v24, %v126_v25 }
  0x3d   :  { %v1695_v32 = vcombine.high %v123_v27, %v127_v28  ;;  %v85_v36 = vld [vmem:[#allocation2 + $0x28] sm:$0xff]  ;;  %v1694_v38 = vcombine.low %v123_v27, %v127_v28  ;;  %v1701_v39 = vcombine.high %v80_v33, %v84_v34  ;;  %v88_v41 = vld [vmem:[#allocation2 + $0x40] sm:$0xff]  ;;  %v1700_v45 = vcombine.low %v80_v33, %v84_v34  ;;  %v82_v62 = vld [vmem:[#allocation2 + $0x10] sm:$0xff] }
  0x3e   :  { %v1703_v40 = vcombine.high %v81_v35, %v85_v36  ;;  %v92_v42 = vld [vmem:[#allocation2 + $0x60] sm:$0xff]  ;;  %v89_v43 = vld [vmem:[#allocation2 + $0x48] sm:$0xff]  ;;  %v1702_v46 = vcombine.low %v81_v35, %v85_v36  ;;  %v86_v63 = vld [vmem:[#allocation2 + $0x30] sm:$0xff] }
  0x3f   :  { %215 = vmatpush1.bf16.msra.mxu0 %v1688_v18  ;;  %256 = vmatpush1.bf16.msra.mxu1 %v1690_v21  ;;  %v93_v44 = vld [vmem:[#allocation2 + $0x68] sm:$0xff]  ;;  %v1709_v47 = vcombine.high %v88_v41, %v92_v42  ;;  %v96_v49 = vld [vmem:[#allocation2 + $0x80] sm:$0xff]  ;;  %v1708_v53 = vcombine.low %v88_v41, %v92_v42  ;;  %v83_v3 = vld [vmem:[#allocation2 + $0x18] sm:$0xff]  ;;  %v1705_v11 = vcombine.high %v82_v62, %v86_v63 }
  0x40   :  { %294 = vmatprep.subr.bf16.mxu0 %v1685_v22  ;;  %335 = vmatprep.subr.bf16.mxu1 %v1687_v23  ;;  %v1711_v48 = vcombine.high %v89_v43, %v93_v44  ;;  %v100_v50 = vld [vmem:[#allocation2 + $0xa0] sm:$0xff]  ;;  %v97_v51 = vld [vmem:[#allocation2 + $0x88] sm:$0xff]  ;;  %v1710_v56 = vcombine.low %v89_v43, %v93_v44  ;;  %v87_v4 = vld [vmem:[#allocation2 + $0x38] sm:$0xff]  ;;  %v1704_v16 = vcombine.low %v82_v62, %v86_v63 }
  0x41   :  { %v101_v52 = vld [vmem:[#allocation2 + $0xa8] sm:$0xff]  ;;  %v104_v54 = vld [vmem:[#allocation2 + $0xc0] sm:$0xff]  ;;  %v1717_v57 = vcombine.high %v96_v49, %v100_v50  ;;  %v1716_v61 = vcombine.low %v96_v49, %v100_v50  ;;  %v90_v8 = vld [vmem:[#allocation2 + $0x50] sm:$0xff]  ;;  %v1707_v14 = vcombine.high %v83_v3, %v87_v4  ;;  %v1706_v19 = vcombine.low %v83_v3, %v87_v4 }
  0x42   :  { %1696 = vmatmul.mubr.msk.bf16.vlgmr.msra.gmra.mrb[0].mxu0 %vm208_vm0, %v77_v26  ;;  %1697 = vmatmul.mubr.msk.bf16.vlgmr.msra.gmra.mrb[0].mxu1 %vm208_vm0, %v77_v26  ;;  %v108_v55 = vld [vmem:[#allocation2 + $0xe0] sm:$0xff]  ;;  %v105_v58 = vld [vmem:[#allocation2 + $0xc8] sm:$0xff]  ;;  %v1719_v60 = vcombine.high %v97_v51, %v101_v52  ;;  %v1718_v1 = vcombine.low %v97_v51, %v101_v52  ;;  %v94_v9 = vld [vmem:[#allocation2 + $0x70] sm:$0xff] }
  0x43   :  { %295 = vmatpush1.bf16.msra.mxu0 %v1684_v29  ;;  %336 = vmatpush1.bf16.msra.mxu1 %v1686_v30  ;;  %v109_v59 = vld [vmem:[#allocation2 + $0xe8] sm:$0xff]  ;;  %v1725_v2 = vcombine.high %v104_v54, %v108_v55  ;;  %v74_v6 = vld [vmem:[%s2242_s0] sm:$0x3]  ;;  %v1724_v7 = vcombine.low %v104_v54, %v108_v55  ;;  %v91_v12 = vld [vmem:[#allocation2 + $0x58] sm:$0xff]  ;;  %v1713_v20 = vcombine.high %v90_v8, %v94_v9 }
  0x44   :  { %296 = vmatprep.subr.bf16.mxu0 %v1693_v31  ;;  %337 = vmatprep.subr.bf16.mxu1 %v1695_v32  ;;  %v1727_v5 = vcombine.high %v105_v58, %v109_v59  ;;  %v1726_v10 = vcombine.low %v105_v58, %v109_v59  ;;  %v95_v13 = vld [vmem:[#allocation2 + $0x78] sm:$0xff]  ;;  %v2160_v15 = vpack.c.bf16 %v74_v6, %v74_v6  ;;  %v98_v17 = vld [vmem:[#allocation2 + $0x90] sm:$0xff]  ;;  %v704_v33 = vld [vmem:[%s2247_s5] sm:$0xff] }
  0x45   :  { %326 = vmatprep.mubr.bf16.mxu0 %v2050_v0  ;;  %367 = vmatprep.mubr.bf16.mxu1 %v2050_v0  ;;  %v102_v18 = vld [vmem:[#allocation2 + $0xb0] sm:$0xff]  ;;  %v99_v21 = vld [vmem:[#allocation2 + $0x98] sm:$0xff]  ;;  %v1715_v23 = vcombine.high %v91_v12, %v95_v13  ;;  %v1712_v24 = vcombine.low %v90_v8, %v94_v9  ;;  %v1714_v27 = vcombine.low %v91_v12, %v95_v13  ;;  %v708_v34 = vld [vmem:[%s2247_s5 + $0x20] sm:$0xff] }
  0x46   :  { %v103_v22 = vld [vmem:[#allocation2 + $0xb8] sm:$0xff]  ;;  %v106_v25 = vld [vmem:[#allocation2 + $0xd0] sm:$0xff]  ;;  %v1721_v28 = vcombine.high %v98_v17, %v102_v18  ;;  %v1720_v32 = vcombine.low %v98_v17, %v102_v18  ;;  %v1737_v42 = vcombine.high %v704_v33, %v708_v34  ;;  %v78_v50 = vld [vmem:[%s2244_s2] sm:$0x3] }
  0x47   :  { %297 = vmatpush1.bf16.msra.mxu0 %v1692_v37  ;;  %338 = vmatpush1.bf16.msra.mxu1 %v1694_v38  ;;  %v107_v29 = vld [vmem:[#allocation2 + $0xd8] sm:$0xff]  ;;  %v1723_v31 = vcombine.high %v99_v21, %v103_v22  ;;  %v1722_v35 = vcombine.low %v99_v21, %v103_v22  ;;  %v705_v37 = vld [vmem:[%s2247_s5 + $0x8] sm:$0xff]  ;;  %v706_v43 = vld [vmem:[%s2247_s5 + $0x10] sm:$0xff] }
  0x48   :  { %540 = vmatprep.subr.bf16.mxu0 %v1701_v39  ;;  %581 = vmatprep.subr.bf16.mxu1 %v1703_v40  ;;  %v111_v30 = vld [vmem:[#allocation2 + $0xf8] sm:$0xff]  ;;  %v709_v38 = vld [vmem:[%s2247_s5 + $0x28] sm:$0xff]  ;;  %v710_v44 = vld [vmem:[%s2247_s5 + $0x30] sm:$0xff] }
  0x49   :  { %v1731_v39 = vcombine.high %v107_v29, %v111_v30  ;;  %v1730_v41 = vcombine.low %v107_v29, %v111_v30  ;;  %v1738_v49 = vcombine.low %v705_v37, %v709_v38  ;;  %v1741_v51 = vcombine.high %v706_v43, %v710_v44  ;;  %v1911_v58 = vld [vmem:[#allocation6] sm:$0xff]   ;;  %v1915_v62 = vld [vmem:[#allocation6 + $0x8] sm:$0xff]   ;;  %v1920_v3 = vld [vmem:[#allocation6 + $0x90] sm:$0xff]  }
  0x4a   :  { %1698 = vmatmul.mubr.msk.bf16.vlgmr.msra.gmra.mrb[4].mxu0 %vm208_vm0, %v77_v26  ;;  %1699 = vmatmul.mubr.msk.bf16.vlgmr.msra.gmra.mrb[4].mxu1 %vm208_vm0, %v77_v26  ;;  %v110_v26 = vld [vmem:[#allocation2 + $0xf0] sm:$0xff]  ;;  %v1740_v54 = vcombine.low %v706_v43, %v710_v44  ;;  %v1912_v59 = vld [vmem:[#allocation6 + $0x80] sm:$0xff]   ;;  %v1916_v63 = vld [vmem:[#allocation6 + $0x88] sm:$0xff]  }
  0x4b   :  { %541 = vmatpush1.bf16.msra.mxu0 %v1700_v45  ;;  %582 = vmatpush1.bf16.msra.mxu1 %v1702_v46  ;;  %v1729_v36 = vcombine.high %v106_v25, %v110_v26  ;;  %v1728_v40 = vcombine.low %v106_v25, %v110_v26  ;;  %v1739_v45 = vcombine.high %v705_v37, %v709_v38  ;;  %v707_v46 = vld [vmem:[%s2247_s5 + $0x18] sm:$0xff]  ;;  %v1925_v8 = vld [vmem:[#allocation6 + $0x60] sm:$0xff]   ;;  %v1929_v12 = vld [vmem:[#allocation6 + $0x68] sm:$0xff]  }
  0x4c   :  { %542 = vmatprep.subr.bf16.mxu0 %v1709_v47  ;;  %583 = vmatprep.subr.bf16.mxu1 %v1711_v48  ;;  %v711_v47 = vld [vmem:[%s2247_s5 + $0x38] sm:$0xff]  ;;  %v1736_v48 = vcombine.low %v704_v33, %v708_v34  ;;  %v1926_v9 = vld [vmem:[#allocation6 + $0xe0] sm:$0xff]   ;;  %v1930_v13 = vld [vmem:[#allocation6 + $0xe8] sm:$0xff]  }
  0x4d   :  { %572 = vmatprep.mubr.bf16.mxu0 %v2050_v0  ;;  %613 = vmatprep.mubr.bf16.mxu1 %v2050_v0  ;;  %v1743_v52 = vcombine.high %v707_v46, %v711_v47  ;;  %v1742_v55 = vcombine.low %v707_v46, %v711_v47  ;;  %v1921_v4 = vld [vmem:[#allocation6 + $0x58] sm:$0xff]   ;;  %v1934_v17 = vld [vmem:[#allocation6 + $0xf0] sm:$0xff]   ;;  %v1942_v25 = vld [vmem:[#allocation6 + $0x1c0] sm:$0xff]  }
  0x4e   :  { %v1923_v6 = vld [vmem:[#allocation6 + $0x18] sm:$0xff]   ;;  %v1935_v18 = vld [vmem:[#allocation6 + $0x30] sm:$0xff]  }
  0x4f   :  { %543 = vmatpush1.bf16.msra.mxu0 %v1708_v53  ;;  %584 = vmatpush1.bf16.msra.mxu1 %v1710_v56  ;;  %v79_v53 = vpack.c.bf16 %v78_v50, %v78_v50  ;;  %v1909_v56 = vld [vmem:[#allocation6 + $0x40] sm:$0xff]   ;;  %v1938_v21 = vld [vmem:[#allocation6 + $0xf8] sm:$0xff]  }
  0x50   :  { %544 = vmatprep.subr.bf16.mxu0 %v1717_v57  ;;  %585 = vmatprep.subr.bf16.mxu1 %v1719_v60  ;;  %v1910_v57 = vld [vmem:[#allocation6 + $0xc0] sm:$0xff]   ;;  %v1913_v60 = vld [vmem:[#allocation6 + $0x48] sm:$0xff]   ;;  %v1939_v22 = vld [vmem:[#allocation6 + $0x38] sm:$0xff]  }
  0x53   :  { %545 = vmatpush1.bf16.msra.mxu0 %v1716_v61  ;;  %586 = vmatpush1.bf16.msra.mxu1 %v1718_v1  ;;  %v1914_v61 = vld [vmem:[#allocation6 + $0xc8] sm:$0xff]   ;;  %v1917_v1 = vld [vmem:[#allocation6 + $0x50] sm:$0xff]  }
  0x54   :  { %546 = vmatprep.subr.bf16.mxu0 %v1725_v2  ;;  %587 = vmatprep.subr.bf16.mxu1 %v1727_v5  ;;  %v1918_v2 = vld [vmem:[#allocation6 + $0xd0] sm:$0xff]   ;;  %v1922_v5 = vld [vmem:[#allocation6 + $0xd8] sm:$0xff]  }
  0x57   :  { %547 = vmatpush1.bf16.msra.mxu0 %v1724_v7  ;;  %588 = vmatpush1.bf16.msra.mxu1 %v1726_v10  ;;  %v1924_v7 = vld [vmem:[#allocation6 + $0x98] sm:$0xff]   ;;  %v1927_v10 = vld [vmem:[#allocation6 + $0x20] sm:$0xff]  }
  0x58   :  { %622 = vmatprep.subr.bf16.mxu0 %v1705_v11  ;;  %663 = vmatprep.subr.bf16.mxu1 %v1707_v14  ;;  %v1928_v11 = vld [vmem:[#allocation6 + $0xa0] sm:$0xff]   ;;  %v1931_v14 = vld [vmem:[#allocation6 + $0x28] sm:$0xff]  }
  0x5a   :  { %1732 = vmatmul.mubr.msk.bf16.vlgmr.msra.gmra.mrb[8].mxu0 %vm536_vm1, %v2160_v15  ;;  %1733 = vmatmul.mubr.msk.bf16.vlgmr.msra.gmra.mrb[8].mxu1 %vm536_vm1, %v2160_v15 }
  0x5b   :  { %623 = vmatpush1.bf16.msra.mxu0 %v1704_v16  ;;  %664 = vmatpush1.bf16.msra.mxu1 %v1706_v19  ;;  %v1933_v16 = vld [vmem:[#allocation6 + $0x70] sm:$0xff]  }
  0x5c   :  { %624 = vmatprep.subr.bf16.mxu0 %v1713_v20  ;;  %665 = vmatprep.subr.bf16.mxu1 %v1715_v23  ;;  %v1936_v19 = vld [vmem:[#allocation6 + $0xb0] sm:$0xff]   ;;  %v1937_v20 = vld [vmem:[#allocation6 + $0x78] sm:$0xff]  }
  0x5d   :  { %654 = vmatprep.mubr.bf16.mxu0 %v2050_v0  ;;  %695 = vmatprep.mubr.bf16.mxu1 %v2050_v0  ;;  %v1940_v23 = vld [vmem:[#allocation6 + $0xb8] sm:$0xff]  }
  0x5f   :  { %625 = vmatpush1.bf16.msra.mxu0 %v1712_v24  ;;  %666 = vmatpush1.bf16.msra.mxu1 %v1714_v27  ;;  %v1941_v24 = vld [vmem:[#allocation6 + $0x140] sm:$0xff]  }
  0x60   :  { %626 = vmatprep.subr.bf16.mxu0 %v1721_v28  ;;  %667 = vmatprep.subr.bf16.mxu1 %v1723_v31 }
  0x63   :  { %627 = vmatpush1.bf16.msra.mxu0 %v1720_v32  ;;  %668 = vmatpush1.bf16.msra.mxu1 %v1722_v35 }
  0x64   :  { %628 = vmatprep.subr.bf16.mxu0 %v1729_v36  ;;  %669 = vmatprep.subr.bf16.mxu1 %v1731_v39 }
  0x67   :  { %629 = vmatpush1.bf16.msra.mxu0 %v1728_v40  ;;  %670 = vmatpush1.bf16.msra.mxu1 %v1730_v41 }
  0x68   :  { %756 = vmatprep.subr.bf16.mxu0 %v1737_v42  ;;  %797 = vmatprep.subr.bf16.mxu1 %v1739_v45 }
  0x6a   :  { %1734 = vmatmul.mubr.msk.bf16.vlgmr.msra.gmra.mrb[12].mxu0 %vm536_vm1, %v2160_v15  ;;  %1735 = vmatmul.mubr.msk.bf16.vlgmr.msra.gmra.mrb[12].mxu1 %vm536_vm1, %v2160_v15  ;;  %v1932_v15 = vld [vmem:[#allocation6 + $0xa8] sm:$0xff]  }
  0x6b   :  { %757 = vmatpush1.bf16.msra.mxu0 %v1736_v48  ;;  %798 = vmatpush1.bf16.msra.mxu1 %v1738_v49 }
  0x6c   :  { %788 = vmatprep.mubr.bf16.mxu0 %v2050_v0  ;;  %829 = vmatprep.mubr.bf16.mxu1 %v2050_v0 }
  0x6d   :  { %838 = vmatprep.subr.bf16.mxu0 %v1741_v51  ;;  %879 = vmatprep.subr.bf16.mxu1 %v1743_v52 }
  0x72   :  { %1744 = vmatmul.mubr.msk.bf16.vlgmr.msra.gmra.mrb[16].mxu0 %vm752_vm2, %v79_v53  ;;  %1745 = vmatmul.mubr.msk.bf16.vlgmr.msra.gmra.mrb[16].mxu1 %vm752_vm2, %v79_v53 }
  0x73   :  { %839 = vmatpush1.bf16.msra.mxu0 %v1740_v54  ;;  %880 = vmatpush1.bf16.msra.mxu1 %v1742_v55  ;;  %v930_v54 = vlaneseq }
  0x74   :  { %870 = vmatprep.mubr.bf16.mxu0 %v2050_v0  ;;  %911 = vmatprep.mubr.bf16.mxu1 %v2050_v0  ;;  %v1919_v0 = vld [vmem:[#allocation6 + $0x10] sm:$0xff]  }
  0x75   :  { %1813 = vmatprep.subr.bf16.mxu0 %v1909_v56  ;;  %1835 = vmatprep.subr.bf16.mxu1 %v1910_v57  ;;  %v2207_v55 = vshrl.u32 %v930_v54, 7 }
  0x7a   :  { %1746 = vmatmul.mubr.msk.bf16.vlgmr.msra.gmra.mrb[20].mxu0 %vm752_vm2, %v79_v53  ;;  %1747 = vmatmul.mubr.msk.bf16.vlgmr.msra.gmra.mrb[20].mxu1 %vm752_vm2, %v79_v53 }
  0x7b   :  { %1814 = vmatpush3.bf16.msra.mxu0 %v1911_v58  ;;  %1836 = vmatpush3.bf16.msra.mxu1 %v1912_v59 }
  0x7c   :  { %1815 = vmatprep.subr.bf16.mxu0 %v1913_v60  ;;  %1837 = vmatprep.subr.bf16.mxu1 %v1914_v61 }
  0x7f   :  { %1816 = vmatpush3.bf16.msra.mxu0 %v1915_v62  ;;  %1838 = vmatpush3.bf16.msra.mxu1 %v1916_v63 }
  0x80   :  { %1817 = vmatprep.subr.bf16.mxu0 %v1917_v1  ;;  %1839 = vmatprep.subr.bf16.mxu1 %v1918_v2 }
  0x83   :  { %1818 = vmatpush3.bf16.msra.mxu0 %v1919_v0  ;;  %1840 = vmatpush3.bf16.msra.mxu1 %v1920_v3  ;;  %v932_v3 = vsub.s32 0, %v2207_v55 }
  0x84   :  { %1819 = vmatprep.subr.bf16.mxu0 %v1921_v4  ;;  %1841 = vmatprep.subr.bf16.mxu1 %v1922_v5  ;;  %v2213_v5 = vld [vmem:[%s2248_s6] sm:$0xff] }
  0x87   :  { %1820 = vmatpush3.bf16.msra.mxu0 %v1923_v6  ;;  %1842 = vmatpush3.bf16.msra.mxu1 %v1924_v7  ;;  %v940_v6 = vsub.s32 2, %v2207_v55  ;;  %v936_v7 = vsub.s32 1, %v2207_v55 }
  0x88   :  { %1821 = vmatprep.subr.bf16.mxu0 %v1925_v8  ;;  %1843 = vmatprep.subr.bf16.mxu1 %v1926_v9  ;;  %v944_v8 = vsub.s32 3, %v2207_v55  ;;  %v933_v9 = vrot.slane %v2213_v5, %v932_v3 }
  0x8b   :  { %1822 = vmatpush3.bf16.msra.mxu0 %v1927_v10  ;;  %1844 = vmatpush3.bf16.msra.mxu1 %v1928_v11  ;;  %v941_v11 = vrot.slane %v2213_v5, %v940_v6  ;;  %v1952_v6 = vld [vmem:[#allocation6 + $0x190] sm:$0xff]  }
  0x8c   :  { %1823 = vmatprep.subr.bf16.mxu0 %v1929_v12  ;;  %1845 = vmatprep.subr.bf16.mxu1 %v1930_v13  ;;  %v937_v12 = vrot.slane %v2213_v5, %v936_v7  ;;  %v1953_v7 = vld [vmem:[#allocation6 + $0x158] sm:$0xff]  }
  0x8f   :  { %1824 = vmatpush3.bf16.msra.mxu0 %v1931_v14  ;;  %1846 = vmatpush3.bf16.msra.mxu1 %v1932_v15 }
  0x90   :  { %1825 = vmatprep.subr.bf16.mxu0 %v1933_v16  ;;  %1847 = vmatprep.subr.bf16.mxu1 %v1934_v17  ;;  %v945_v16 = vrot.slane %v2213_v5, %v944_v8  ;;  %v1954_v8 = vld [vmem:[#allocation6 + $0x1d8] sm:$0xff]  }
  0x93   :  { %1826 = vmatpush3.bf16.msra.mxu0 %v1935_v18  ;;  %1848 = vmatpush3.bf16.msra.mxu1 %v1936_v19 }
  0x94   :  { %1827 = vmatprep.subr.bf16.mxu0 %v1937_v20  ;;  %1849 = vmatprep.subr.bf16.mxu1 %v1938_v21 }
  0x97   :  { %1828 = vmatpush3.bf16.msra.mxu0 %v1939_v22  ;;  %1850 = vmatpush3.bf16.msra.mxu1 %v1940_v23 }
  0x98   :  { %1857 = vmatprep.subr.bf16.mxu0 %v1941_v24  ;;  %1879 = vmatprep.subr.bf16.mxu1 %v1942_v25 }
 0x115   :  { %v246_v26 = vpop.f32.mrb[0].mxu0  ;;  %v287_v27 = vpop.f32.mrb[0].mxu1 }
 0x116   :  { %v248_v28 = vpop.f32.mrb[1].mxu0  ;;  %v289_v29 = vpop.f32.mrb[1].mxu1 }
 0x117   :  { %v250_v30 = vpop.f32.mrb[2].mxu0  ;;  %v291_v31 = vpop.f32.mrb[2].mxu1 }
 0x118   :  { %v251_v32 = vpop.f32.mrb[3].mxu0  ;;  %v292_v33 = vpop.f32.mrb[3].mxu1  ;;  %v960_v31 = vsub.s32 7, %v2207_v55 }
 0x11d   :  { %v328_v34 = vpop.f32.mrb[4].mxu0  ;;  %v369_v35 = vpop.f32.mrb[4].mxu1 }
 0x11e   :  { %v330_v36 = vpop.f32.mrb[5].mxu0  ;;  %v371_v37 = vpop.f32.mrb[5].mxu1 }
 0x11f   :  { %v332_v38 = vpop.f32.mrb[6].mxu0  ;;  %v373_v39 = vpop.f32.mrb[6].mxu1 }
 0x120   :  { %v333_v40 = vpop.f32.mrb[7].mxu0  ;;  %v374_v41 = vpop.f32.mrb[7].mxu1  ;;  %v1943_v38 = vld [vmem:[#allocation6 + $0x100] sm:$0xff]  }
 0x12d   :  { %v574_v42 = vpop.f32.mrb[8].mxu0  ;;  %v615_v44 = vpop.f32.mrb[8].mxu1 }
 0x12e   :  { %v575_v43 = vadd.f32 %v574_v42, %v246_v26  ;;  %v576_v45 = vpop.f32.mrb[9].mxu0  ;;  %v616_v46 = vadd.f32 %v615_v44, %v287_v27  ;;  %v617_v48 = vpop.f32.mrb[9].mxu1  ;;  %v961_v44 = vrot.slane %v2213_v5, %v960_v31 }
 0x12f   :  { %v577_v47 = vadd.f32 %v576_v45, %v248_v28  ;;  %v578_v49 = vpop.f32.mrb[10].mxu0  ;;  %v618_v50 = vadd.f32 %v617_v48, %v289_v29  ;;  %v619_v51 = vpop.f32.mrb[10].mxu1  ;;  %v952_v28 = vsub.s32 5, %v2207_v55  ;;  %v1944_v45 = vld [vmem:[#allocation6 + $0x180] sm:$0xff]  }
 0x130   :  { %v579_v52 = vpop.f32.mrb[11].mxu0  ;;  %v620_v53 = vpop.f32.mrb[11].mxu1  ;;  %v1946_v51 = vld [vmem:[#allocation6 + $0x1c8] sm:$0xff]  }
 0x13d   :  { %v656_v56 = vpop.f32.mrb[12].mxu0  ;;  %v697_v58 = vpop.f32.mrb[12].mxu1 }
 0x13e   :  { %v657_v57 = vadd.f32 %v656_v56, %v328_v34  ;;  %v658_v59 = vpop.f32.mrb[13].mxu0  ;;  %v698_v60 = vadd.f32 %v697_v58, %v369_v35  ;;  %v699_v62 = vpop.f32.mrb[13].mxu1  ;;  %v1947_v58 = vld [vmem:[#allocation6 + $0x108] sm:$0xff]  }
 0x13f   :  { %v659_v61 = vadd.f32 %v658_v59, %v330_v36  ;;  %v660_v63 = vpop.f32.mrb[14].mxu0  ;;  %v700_v1 = vadd.f32 %v699_v62, %v371_v37  ;;  %v701_v2 = vpop.f32.mrb[14].mxu1  ;;  %v953_v37 = vrot.slane %v2213_v5, %v952_v28 }
 0x140   :  { %v661_v0 = vpop.f32.mrb[15].mxu0  ;;  %v702_v4 = vpop.f32.mrb[15].mxu1  ;;  %v1949_v63 = vld [vmem:[#allocation6 + $0x150] sm:$0xff]  }
 0x141   :  { %v1950_v2 = vld [vmem:[#allocation6 + $0x1d0] sm:$0xff]  }
 0x145   :  { %v790_v10 = vpop.f32.mrb[16].mxu0  ;;  %v831_v14 = vpop.f32.mrb[16].mxu1 }
 0x146   :  { %v920_v13 = vadd.f32 %v790_v10, %v575_v43  ;;  %v792_v15 = vpop.f32.mrb[17].mxu0  ;;  %v922_v17 = vadd.f32 %v831_v14, %v616_v46  ;;  %v833_v19 = vpop.f32.mrb[17].mxu1  ;;  %v1945_v46 = vld [vmem:[#allocation6 + $0x148] sm:$0xff]   ;;  %v1956_v10 = vld [vmem:[#allocation6 + $0x198] sm:$0xff]   ;;  %v948_v14 = vsub.s32 4, %v2207_v55 }
 0x147   :  { %v921_v18 = vadd.f32 %v792_v15, %v577_v47  ;;  %v794_v20 = vpop.f32.mrb[18].mxu0  ;;  %v923_v22 = vadd.f32 %v833_v19, %v618_v50  ;;  %v835_v23 = vpop.f32.mrb[18].mxu1  ;;  %v1960_v15 = vld [vmem:[#allocation6 + $0x1a0] sm:$0xff]   ;;  %v1963_v19 = vld [vmem:[#allocation6 + $0x128] sm:$0xff]  }
 0x148   :  { %v970_v21 = vadd.f32 %v933_v9, %v920_v13  ;;  %v795_v24 = vpop.f32.mrb[19].mxu0  ;;  %v972_v25 = vadd.f32 %v941_v11, %v922_v17  ;;  %v836_v27 = vpop.f32.mrb[19].mxu1  ;;  %v1955_v9 = vld [vmem:[#allocation6 + $0x118] sm:$0xff]   ;;  %v1957_v11 = vld [vmem:[#allocation6 + $0x160] sm:$0xff]   ;;  %v956_v17 = vsub.s32 6, %v2207_v55  ;;  %v949_v20 = vrot.slane %v2213_v5, %v948_v14  ;;  %v1968_v55 = vld [vmem:[#allocation6 + $0x1b0] sm:$0xff]  }
 0x149   :  { %v971_v26 = vadd.f32 %v937_v12, %v921_v18  ;;  %v973_v30 = vadd.f32 %v945_v16, %v923_v22  ;;  %v1958_v12 = vld [vmem:[#allocation6 + $0x1e0] sm:$0xff]   ;;  %v1961_v16 = vld [vmem:[#allocation6 + $0x168] sm:$0xff]   ;;  %v1965_v22 = vld [vmem:[#allocation6 + $0x170] sm:$0xff]  }
 0x14a   :  { %v978_v29 = vmax.f32 %v970_v21, 0.0  ;;  %v980_v32 = vmax.f32 %v972_v25, 0.0  ;;  %v1959_v13 = vld [vmem:[#allocation6 + $0x120] sm:$0xff]   ;;  %v1962_v18 = vld [vmem:[#allocation6 + $0x1e8] sm:$0xff]   ;;  %v957_v23 = vrot.slane %v2213_v5, %v956_v17  ;;  %v1966_v24 = vld [vmem:[#allocation6 + $0x1f0] sm:$0xff]  }
 0x14b   :  { %v979_v33 = vmax.f32 %v971_v26, 0.0  ;;  %v981_v34 = vmax.f32 %v973_v30, 0.0  ;;  %v1964_v21 = vld [vmem:[#allocation6 + $0x1a8] sm:$0xff]   ;;  %v1967_v25 = vld [vmem:[#allocation6 + $0x130] sm:$0xff]   ;;  %v1969_v27 = vld [vmem:[#allocation6 + $0x178] sm:$0xff]  }
 0x14c   :  { %v986_v39 = vpack.c.bf16 %v978_v29, %v978_v29  ;;  %v988_v47 = vpack.c.bf16 %v980_v32, %v980_v32  ;;  %v1970_v29 = vld [vmem:[#allocation6 + $0x1f8] sm:$0xff]  }
 0x14d   :  { %v987_v35 = vpack.c.bf16 %v979_v33, %v979_v33  ;;  %v872_v36 = vpop.f32.mrb[20].mxu0  ;;  %v989_v40 = vpack.c.bf16 %v981_v34, %v981_v34  ;;  %v913_v42 = vpop.f32.mrb[20].mxu1  ;;  %v1971_v30 = vld [vmem:[#allocation6 + $0x138] sm:$0xff]  }
 0x14e   :  { %v2225_v41 = vadd.f32 %v872_v36, %v657_v57  ;;  %v874_v43 = vpop.f32.mrb[21].mxu0  ;;  %v2228_v48 = vadd.f32 %v913_v42, %v698_v60  ;;  %v915_v50 = vpop.f32.mrb[21].mxu1  ;;  %v1948_v60 = vld [vmem:[#allocation6 + $0x188] sm:$0xff]   ;;  %v1972_v5 = vld [vmem:[#allocation6 + $0x1b8] sm:$0xff]  }
 0x14f   :  { %v925_v49 = vadd.f32 %v874_v43, %v659_v61  ;;  %1545 = vmatprep.mubr.bf16.mxu0 %v987_v35  ;;  %v876_v52 = vpop.f32.mrb[22].mxu0  ;;  %v927_v53 = vadd.f32 %v915_v50, %v700_v1  ;;  %1585 = vmatprep.mubr.bf16.mxu1 %v989_v40  ;;  %v917_v56 = vpop.f32.mrb[22].mxu1  ;;  %v1951_v1 = vld [vmem:[#allocation6 + $0x110] sm:$0xff]  }
 0x150   :  { %1546 = vmatmul.mubr.bf16.vlgmr.msra.gmra.mrb[24].mxu0 %v986_v39  ;;  %v877_v54 = vpop.f32.mrb[23].mxu0  ;;  %1586 = vmatmul.mubr.bf16.vlgmr.msra.gmra.mrb[24].mxu1 %v988_v47  ;;  %v918_v59 = vpop.f32.mrb[23].mxu1  ;;  %v974_v26 = vadd.f32 %v949_v20, %v2225_v41  ;;  %v976_v28 = vadd.f32 %v957_v23, %v2228_v48 }
 0x151   :  { %v975_v57 = vadd.f32 %v953_v37, %v925_v49  ;;  %1858 = vmatpush3.bf16.msra.mxu0 %v1943_v38  ;;  %v977_v62 = vadd.f32 %v961_v44, %v927_v53  ;;  %1880 = vmatpush3.bf16.msra.mxu1 %v1944_v45  ;;  %v1748_v37 = vld [vmem:[%s2250_s8] ss:$0 sm:$0xff] }
 0x152   :  { %1859 = vmatprep.subr.bf16.mxu0 %v1945_v46  ;;  %1881 = vmatprep.subr.bf16.mxu1 %v1946_v51  ;;  %v982_v31 = vmax.f32 %v974_v26, 0.0  ;;  %v984_v32 = vmax.f32 %v976_v28, 0.0 }
 0x153   :  { %v983_v61 = vmax.f32 %v975_v57, 0.0  ;;  %v985_v0 = vmax.f32 %v977_v62, 0.0 }
 0x154   :  { %v990_v33 = vpack.c.bf16 %v982_v31, %v982_v31  ;;  %v992_v34 = vpack.c.bf16 %v984_v32, %v984_v32 }
 0x155   :  { %v991_v3 = vpack.c.bf16 %v983_v61, %v983_v61  ;;  %1860 = vmatpush3.bf16.msra.mxu0 %v1947_v58  ;;  %v993_v4 = vpack.c.bf16 %v985_v0, %v985_v0  ;;  %1882 = vmatpush3.bf16.msra.mxu1 %v1948_v60 }
 0x156   :  { %1861 = vmatprep.subr.bf16.mxu0 %v1949_v63  ;;  %1883 = vmatprep.subr.bf16.mxu1 %v1950_v2 }
 0x157   :  { %1625 = vmatprep.mubr.bf16.mxu0 %v991_v3  ;;  %1665 = vmatprep.mubr.bf16.mxu1 %v993_v4 }
 0x159   :  { %1862 = vmatpush3.bf16.msra.mxu0 %v1951_v1  ;;  %1884 = vmatpush3.bf16.msra.mxu1 %v1952_v6 }
 0x15a   :  { %1863 = vmatprep.subr.bf16.mxu0 %v1953_v7  ;;  %1885 = vmatprep.subr.bf16.mxu1 %v1954_v8 }
 0x15d   :  { %1864 = vmatpush3.bf16.msra.mxu0 %v1955_v9  ;;  %1886 = vmatpush3.bf16.msra.mxu1 %v1956_v10 }
 0x15e   :  { %1865 = vmatprep.subr.bf16.mxu0 %v1957_v11  ;;  %1887 = vmatprep.subr.bf16.mxu1 %v1958_v12 }
 0x161   :  { %1866 = vmatpush3.bf16.msra.mxu0 %v1959_v13  ;;  %1888 = vmatpush3.bf16.msra.mxu1 %v1960_v15 }
 0x162   :  { %1867 = vmatprep.subr.bf16.mxu0 %v1961_v16  ;;  %1889 = vmatprep.subr.bf16.mxu1 %v1962_v18 }
 0x165   :  { %1868 = vmatpush3.bf16.msra.mxu0 %v1963_v19  ;;  %1890 = vmatpush3.bf16.msra.mxu1 %v1964_v21 }
 0x166   :  { %1869 = vmatprep.subr.bf16.mxu0 %v1965_v22  ;;  %1891 = vmatprep.subr.bf16.mxu1 %v1966_v24 }
 0x169   :  { %1870 = vmatpush3.bf16.msra.mxu0 %v1967_v25  ;;  %1892 = vmatpush3.bf16.msra.mxu1 %v1968_v55 }
 0x16a   :  { %1871 = vmatprep.subr.bf16.mxu0 %v1969_v27  ;;  %1893 = vmatprep.subr.bf16.mxu1 %v1970_v29 }
 0x16d   :  { %1872 = vmatpush3.bf16.msra.mxu0 %v1971_v30  ;;  %1894 = vmatpush3.bf16.msra.mxu1 %v1972_v5 }
 0x170   :  { %1626 = vmatmul.mubr.bf16.vlgmr.msra.gmra.mrb[28].mxu0 %v990_v33  ;;  %1666 = vmatmul.mubr.bf16.vlgmr.msra.gmra.mrb[28].mxu1 %v992_v34 }
 0x223   :  { %v1829_v35 = vpop.f32.mrb[24].mxu0  ;;  %v1851_v36 = vpop.f32.mrb[24].mxu1 }
 0x224   :  { %v1830_v38 = vpop.f32.mrb[25].mxu0  ;;  %v1852_v40 = vpop.f32.mrb[25].mxu1 }
 0x225   :  { %v1831_v39 = vadd.f32 %v1830_v38, %v1829_v35  ;;  %v1832_v41 = vpop.f32.mrb[26].mxu0  ;;  %v1853_v42 = vadd.f32 %v1852_v40, %v1851_v36  ;;  %v1854_v43 = vpop.f32.mrb[26].mxu1 }
 0x226   :  { %v1833_v44 = vpop.f32.mrb[27].mxu0  ;;  %v1855_v46 = vpop.f32.mrb[27].mxu1 }
 0x227   :  { %v1548_v45 = vadd.f32 %v1831_v39, %v1748_v37 }
 0x229   :  { %v1588_v47 = vadd.f32 %v1853_v42, %v1548_v45 }
 0x243   :  { %v1873_v48 = vpop.f32.mrb[28].mxu0  ;;  %v1895_v49 = vpop.f32.mrb[28].mxu1 }
 0x244   :  { %v1874_v50 = vpop.f32.mrb[29].mxu0  ;;  %v1896_v52 = vpop.f32.mrb[29].mxu1 }
 0x245   :  { %v1875_v51 = vadd.f32 %v1874_v50, %v1873_v48  ;;  %v1876_v53 = vpop.f32.mrb[30].mxu0  ;;  %v1897_v54 = vadd.f32 %v1896_v52, %v1895_v49  ;;  %v1898_v56 = vpop.f32.mrb[30].mxu1 }
 0x246   :  { %v1877_v57 = vpop.f32.mrb[31].mxu0  ;;  %v1899_v59 = vpop.f32.mrb[31].mxu1 }
 0x247   :  { %v1628_v58 = vadd.f32 %v1875_v51, %v1588_v47 }
 0x249   :  { %v1668_v62 = vadd.f32 %v1897_v54, %v1628_v58 }
 0x24b   :  { %1673 = vst [vmem:[%s2251_s9] sm:$0x3] %v1668_v62 }
 0x24c   :  { %1678 = vsyncpa [#allocation3], 1 }
 0x24d   :  { %1679 = vsyncpa [#allocation5], 1 }

</bundles_post_ra>
